<compile_context>
chip_gen: v7x
topology: tpu7x:2x2x1
jax: 0.10.0
libtpu: 0.0.40
codegen_flags: <defaults>
</compile_context>

<pallas_src>
import functools

import jax
import jax.numpy as jnp
import numpy as np
from jax.experimental import pallas as pl
from jax.experimental.pallas import tpu as pltpu

_LN512 = float(np.log(512.0))


def _attn_norm_kernel(x_ref, o_ref, *, method, scale_val, keep_mask_select):
    """One (tm, L) row block. All reductions are along the last (lane) axis."""
    x = x_ref[...]

    if method == "squared_relu":
        r = jnp.maximum(x, 0)
        o_ref[...] = (r * r).astype(o_ref.dtype)
        return

    if method == "softmax_plus":
        if keep_mask_select:
            # L == 1 (scale_val == 0): the mask/select is NOT redundant --
            # keep torch semantics exactly (-inf rows keep scale 1.0).
            mask = x > jnp.asarray(-jnp.inf / 10.0, x.dtype)
            x = x * jnp.where(mask,
                              jnp.asarray(scale_val, x.dtype),
                              jnp.asarray(1.0, x.dtype))
        else:
            # L >= 2  =>  scale_val > 0  =>  (-inf)*scale == -inf == (-inf)*1.
            # A single vmul replaces the compare + select of the old kernel.
            x = x * jnp.asarray(scale_val, x.dtype)

    # Numerically stable softmax along the lane axis. Row max in the native
    # dtype (comparisons are exact); only the shifted values go to f32 for
    # exp/sum, halving the largest live temporary for 16-bit inputs.
    m = jnp.max(x, axis=-1, keepdims=True)
    e = jnp.exp((x - m).astype(jnp.float32))
    s = jnp.sum(e, axis=-1, keepdims=True)
    inv = pl.reciprocal(s, approx=False)       # exact; per-row column only
    o_ref[...] = (e * inv).astype(o_ref.dtype)
    # NOTE: a fully -inf row yields 0 * inf = NaN, matching the torch module.


def _attn_norm_xla(x, method, scale_val, keep_mask_select):
    """Plain-XLA path used for tiny, non-lane-dense last dims (L < 128)."""
    if method == "squared_relu":
        r = jnp.maximum(x, 0)
        return r * r
    if method == "softmax_plus":
        if keep_mask_select:
            mask = x > (-jnp.inf / 10.0)
            x = x * jnp.where(mask, scale_val, 1.0).astype(x.dtype)
        else:
            x = x * jnp.asarray(scale_val, x.dtype)
    return jax.nn.softmax(x, axis=-1)


def _vmem_limit_bytes():
    """Generation-aware scoped-VMEM limit (leave headroom for Mosaic)."""
    try:
        physical = int(pltpu.get_tpu_info().vmem_capacity_bytes)
    except Exception:
        physical = 64 * 1024 * 1024  # v7x per-TC size: safe lower bound
    limit = min(int(0.75 * physical), 96 * 1024 * 1024)  # 48 MiB v7x, 96 MiB v5e/v6e
    return max(32 * 1024 * 1024, limit)


def _choose_row_tile(R, L, itemsize, vmem_limit):
    """Pick the row-tile size tm for a (tm, L) block."""
    # VMEM per block row: double-buffered input + output in the native dtype
    # plus ~3 f32-wide temporaries materialized inside the kernel.
    per_row = L * (4 * itemsize + 3 * 4)
    tm = int(0.7 * vmem_limit) // max(1, per_row)
    tm = max(8, min(tm, 8192, R))
    # v7x megacore: for >= 1 MiB arrays make sure there are >= ~8 row blocks so
    # the "parallel" grid axis can be sharded across both TensorCores.
    if R * L * itemsize >= (1 << 20) and R >= 64:
        tm = min(tm, R // 8)
    if tm >= R:
        return R                      # single full-dim block (always legal)
    tm = max(8, (tm // 8) * 8)        # sublane-aligned row tile
    return R if tm >= R else tm


def attn_norm_forward(x, method="softmax", *, dim=-1, tm=None, small_l_fallback=True):
    """Forward pass of the PyTorch `attn_norm` module.

    x      : array of shape (..., L)
    method : 'softmax' | 'squared_relu' | 'softmax_plus'
    dim    : only the last dim is supported (module default dim=-1)
    """
    if method not in ("softmax", "squared_relu", "softmax_plus"):
        raise ValueError(f"unknown method: {method}")
    if dim not in (-1, x.ndim - 1):
        # TODO(synk): the torch module allows arbitrary `dim` for plain softmax;
        # only the last-dim (module default, used by all other methods) is here.
        raise NotImplementedError("attn_norm_forward only supports dim=-1")

    orig_shape = x.shape
    L = int(orig_shape[-1])
    R = 1
    for d in orig_shape[:-1]:
        R *= int(d)

    scale_val = float(np.log(L) / _LN512) if L > 1 else 0.0
    keep_mask_select = L < 2          # only L == 1 needs the mask/select

    # Tiny, non-lane-dense last dim: < 1/8 of the vreg lanes would be used and
    # stores become masked vst.msk -- plain XLA is the better tool there.
    if small_l_fallback and L < 128 and (L % 128 != 0):
        return _attn_norm_xla(x, method, scale_val, keep_mask_select)

    # Contiguous reshape -> (R, L): a free view, no HBM copy / transpose.
    x2 = x.reshape(R, L)
    itemsize = jnp.dtype(x.dtype).itemsize
    vmem_limit = _vmem_limit_bytes()

    if tm is None:
        tm = _choose_row_tile(R, L, itemsize, vmem_limit)
    else:
        tm = int(tm)
        tm = R if tm >= R else max(8, (tm // 8) * 8)

    grid = (pl.cdiv(R, tm),)          # masked tail block if tm does not divide R

    kernel = functools.partial(
        _attn_norm_kernel,
        method=method,
        scale_val=scale_val,
        keep_mask_select=keep_mask_select,
    )

    out2 = pl.pallas_call(
        kernel,
        out_shape=jax.ShapeDtypeStruct((R, L), x.dtype),
        grid_spec=pltpu.PrefetchScalarGridSpec(
            num_scalar_prefetch=0,
            grid=grid,
            in_specs=[pl.BlockSpec((tm, L), lambda i: (i, 0))],
            out_specs=pl.BlockSpec((tm, L), lambda i: (i, 0)),
        ),
        compiler_params=pltpu.CompilerParams(
            # Row blocks are fully independent; "parallel" lets v7x megacore
            # shard them across both TensorCores.
            dimension_semantics=("parallel",),
            vmem_limit_bytes=int(vmem_limit),
        ),
    )(x2)

    return out2.reshape(orig_shape)


def _ref_attn_norm(x, method):
    """Pure-JAX reference mirroring the PyTorch module."""
    if method == "softmax":
        return jax.nn.softmax(x, axis=-1)
    if method == "squared_relu":
        return jnp.maximum(x, 0.0) ** 2
    l = x.shape[-1]
    mask = x > (-jnp.inf / 10.0)
    scale = jnp.where(mask, np.log(l) / np.log(512.0), 1.0)
    return jax.nn.softmax(x * scale, axis=-1)


if __name__ == "__main__":
    key = jax.random.PRNGKey(0)
    k1, k2, k3, k4 = jax.random.split(key, 4)

    # Lane-dense attention-logits shape: (batch=2, heads=4, q_len=16, k_len=128).
    x_main = jax.random.normal(k1, (2, 4, 16, 128), dtype=jnp.float32) * 3.0
    # Tiny last dim (16): exercises both the XLA fallback and the forced
    # Pallas full-dim-block (masked-store) path.
    x_small = jax.random.normal(k2, (2, 4, 16, 16), dtype=jnp.float32) * 3.0
    # softmax_plus with ~10% masked (-inf) logits.
    x_masked = x_main + jnp.where(
        jax.random.uniform(k3, x_main.shape) < 0.1, -jnp.inf, 0.0
    )
    # Row count (120) not divisible by a forced tile (16) -> masked tail block.
    x_tail = jax.random.normal(k4, (3, 5, 8, 128), dtype=jnp.float32) * 3.0

    cases = [
        (x_main, "softmax", {}),
        (x_main, "squared_relu", {}),
        (x_main, "softmax_plus", {}),
        (x_masked, "softmax_plus", {}),
        (x_small, "softmax", {}),                               # XLA fallback
        (x_small, "softmax", dict(small_l_fallback=False)),     # forced Pallas
        (x_small, "squared_relu", dict(small_l_fallback=False)),
        (x_small, "softmax_plus", dict(small_l_fallback=False)),
        (x_tail, "softmax", dict(tm=16)),                       # masked tail
    ]

    for x, method, kw in cases:
        out = jax.block_until_ready(attn_norm_forward(x, method, **kw))
        ref = _ref_attn_norm(x, method)
        assert out.shape == x.shape, (method, out.shape, x.shape)
        assert bool(jnp.allclose(out, ref, atol=1e-5, rtol=1e-5)), (method, kw)

    print("KERNEL_OK")
</pallas_src>

<mosaic_0001>
module attributes {stable_mosaic.version = 11 : i64} {
  func.func @_attn_norm_kernel(%arg0: i32, %arg1: memref<128x128xf32, #tpu.memory_space<vmem>>, %arg2: memref<128x128xf32, #tpu.memory_space<vmem>>) attributes {dimension_semantics = [#tpu.dimension_semantics<parallel>], iteration_bounds = array<i64: 1>, scalar_prefetch = 0 : i64, scratch_operands = 0 : i64, tpu.core_type = #tpu.core_type<tc>, window_params = [{transform_indices = @transform_0, window_bounds = array<i64: 128, 128>}, {transform_indices = @transform_1, window_bounds = array<i64: 128, 128>}]} {
    %c0 = arith.constant 0 : index
    %c0_0 = arith.constant 0 : index
    %0 = vector.load %arg1[%c0, %c0_0] : memref<128x128xf32, #tpu.memory_space<vmem>>, vector<128x128xf32>
    %cst = arith.constant dense<0xFF800000> : vector<128xf32>
    %1 = vector.multi_reduction <maximumf>, %0, %cst [1] : vector<128x128xf32> to vector<128xf32>
    %2 = vector.shape_cast %1 : vector<128xf32> to vector<128x1xf32>
    %3 = vector.broadcast %2 : vector<128x1xf32> to vector<128x128xf32>
    %4 = arith.subf %0, %3 : vector<128x128xf32>
    %5 = math.exp %4 : vector<128x128xf32>
    %cst_1 = arith.constant dense<0.000000e+00> : vector<128xf32>
    %6 = vector.multi_reduction <add>, %5, %cst_1 [1] : vector<128x128xf32> to vector<128xf32>
    %7 = vector.shape_cast %6 : vector<128xf32> to vector<128x1xf32>
    %8 = tpu.reciprocal %7 : vector<128x1xf32> -> vector<128x1xf32>
    %9 = vector.broadcast %8 : vector<128x1xf32> to vector<128x128xf32>
    %10 = arith.mulf %5, %9 : vector<128x128xf32>
    %c0_2 = arith.constant 0 : index
    %c0_3 = arith.constant 0 : index
    %11 = vector.load %arg2[%c0_2, %c0_3] : memref<128x128xf32, #tpu.memory_space<vmem>>, vector<128x128xf32>
    tpu.vector_store %arg2[%c0_2, %c0_3], %10 {strides = array<i32>} : memref<128x128xf32, #tpu.memory_space<vmem>>, vector<128x128xf32>,
    return
  }
  func.func @transform_0(%arg0: i32) -> (i32, i32) {
    %c0_i32 = arith.constant 0 : i32
    %c0_i32_0 = arith.constant 0 : i32
    return %arg0, %c0_i32 : i32, i32
  }
  func.func @transform_1(%arg0: i32) -> (i32, i32) {
    %c0_i32 = arith.constant 0 : i32
    %c0_i32_0 = arith.constant 0 : i32
    return %arg0, %c0_i32 : i32, i32
  }
}

</mosaic_0001>

<bundles_post_ra>
// kernel: tpu_custom_call.1
= control target key start
LH: loop header
LB: loop body
LE: loop exit
PB: predicated region body
PF: predicated region fallthrough
CT: control target
= control target key end

     0   :  { %6 = vsyncpa [#allocation3], 0  ;;  %s464_s0 = inlined_call_operand.hbm [shape: f32[128,128], index: 0, kind: input, shape index: {}]   ;;  %s465_s1 = inlined_call_operand.hbm [shape: f32[128,128], index: 1, kind: output, shape index: {}]  }
   0x1   :  { %7 = vsyncpa [#allocation4], 0  ;;  %s332_s6 = smov [#allocation2]   ;;  %s284_s10 = scalar_lea.hbm %s464_s0, 2048 }
   0x2   :  { %s13_s7 = sshll.u32 %s332_s6, 4  ;;  %p285_p0 = scmp.ne.s32.totalorder %s464_s0, %s284_s10  ;;  %s14_s7 = int_to_ptr.vmem [resolvable:$true] %s13_s7 }
   0x3   :  { %p288_p1 = scmp.lt.u32.totalorder %s284_s10, %s464_s0 }
   0x5   :  { %p290_p2 = pnand %p288_p1, %p285_p0 }
   0x7   :  { %293 = shalt.err (!%p290_p2)
}
   0x8   :  { %s294_s15 = scalar_lea.vmem %s14_s7, 2048  ;;  %p299_p4 = scmp.lt.s32.totalorder %s14_s7, %s14_s7 }
   0x9   :  { %p295_p3 = scmp.ne.s32.totalorder %s14_s7, %s294_s15  ;;  %p300_p5 = scmp.lt.s32.totalorder %s294_s15, %s294_s15 }
   0xb   :  { %p301_p6 = por %p300_p5, %p299_p4 }
   0xd   :  { %p302_p7 = pnand %p301_p6, %p295_p3 }
   0xf   :  { %305 = shalt.err (!%p302_p7)
}
  0x10   :  { %s333_s16 = smov 128   ;;  %s334_s17 = smov 8  }
  0x11   :  { %19 = dma.hbm_to_vmem [thread:$0]  %s464_s0, 2048, %s14_s7, [#allocation3], %s333_s16, %s333_s16, %s334_s17  }
  0x12   :  { %328 = dma.done.wait [#allocation3], 2048  }
  0x13   :  { %329 = vsyncadd [#allocation3], 4294965248  ;;  %v23_v0 = vld [vmem:[#allocation2] sm:$0xff]  ;;  %v25_v1 = vld [vmem:[#allocation2 + $0x10] sm:$0xff]  ;;  %s335_s0 = smov [#allocation5]  }
  0x14   :  { %39 = vmax.xlane.f32.xlu0 %v23_v0  ;;  %43 = vmax.xlane.f32.xlu1 %v25_v1  ;;  %v24_v2 = vld [vmem:[#allocation2 + $0x8] sm:$0xff]  ;;  %v26_v3 = vld [vmem:[#allocation2 + $0x18] sm:$0xff]  ;;  %v27_v4 = vld [vmem:[#allocation2 + $0x20] sm:$0xff]  ;;  %s204_s20 = sshll.u32 %s335_s0, 4  ;;  %s205_s20 = int_to_ptr.vmem [resolvable:$true] %s204_s20 }
  0x15   :  { %v28_v5 = vld [vmem:[#allocation2 + $0x28] sm:$0xff]  ;;  %v29_v6 = vld [vmem:[#allocation2 + $0x30] sm:$0xff]  ;;  %v30_v7 = vld [vmem:[#allocation2 + $0x38] sm:$0xff]  ;;  %s306_s21 = scalar_lea.vmem %s205_s20, 2048  ;;  %p311_p9 = scmp.lt.s32.totalorder %s205_s20, %s205_s20 }
  0x16   :  { %v31_v8 = vld [vmem:[#allocation2 + $0x40] sm:$0xff]  ;;  %v32_v9 = vld [vmem:[#allocation2 + $0x48] sm:$0xff]  ;;  %v361_v10 = vld [vmem:[#allocation2 + $0x50] sm:$0xff]  ;;  %p307_p8 = scmp.ne.s32.totalorder %s205_s20, %s306_s21  ;;  %p312_p10 = scmp.lt.s32.totalorder %s306_s21, %s306_s21 }
  0x17   :  { %v363_v11 = vld [vmem:[#allocation2 + $0x58] sm:$0xff]  ;;  %v367_v12 = vld [vmem:[#allocation2 + $0x60] sm:$0xff]  ;;  %v369_v13 = vld [vmem:[#allocation2 + $0x68] sm:$0xff] }
  0x18   :  { %41 = vmax.xlane.f32.xlu0 %v24_v2  ;;  %45 = vmax.xlane.f32.xlu1 %v26_v3  ;;  %v373_v14 = vld [vmem:[#allocation2 + $0x70] sm:$0xff]  ;;  %v375_v15 = vld [vmem:[#allocation2 + $0x78] sm:$0xff]  ;;  %p313_p11 = por %p312_p10, %p311_p9 }
  0x1a   :  { %p314_p12 = pnand %p313_p11, %p307_p8 }
  0x1c   :  { %47 = vmax.xlane.f32.xlu0 %v27_v4  ;;  %49 = vmax.xlane.f32.xlu1 %v28_v5 }
  0x20   :  { %51 = vmax.xlane.f32.xlu0 %v29_v6  ;;  %53 = vmax.xlane.f32.xlu1 %v30_v7 }
  0x24   :  { %55 = vmax.xlane.f32.xlu0 %v31_v8  ;;  %57 = vmax.xlane.f32.xlu1 %v32_v9 }
  0x28   :  { %59 = vmax.xlane.f32.xlu0 %v361_v10  ;;  %61 = vmax.xlane.f32.xlu1 %v363_v11 }
  0x2c   :  { %63 = vmax.xlane.f32.xlu0 %v367_v12  ;;  %65 = vmax.xlane.f32.xlu1 %v369_v13 }
  0x30   :  { %67 = vmax.xlane.f32.xlu0 %v373_v14  ;;  %69 = vmax.xlane.f32.xlu1 %v375_v15 }
  0xa1   :  { %v40_v16 = vpop.xlane.xlu0 %39  ;;  %v44_v17 = vpop.xlane.xlu1 %43 }
  0xa2   :  { %v71_v18 = vsub.f32 %v23_v0, %v40_v16  ;;  %v73_v19 = vsub.f32 %v25_v1, %v44_v17 }
  0xa4   :  { %v87_v20 = vmul.f32 1.442695, %v71_v18  ;;  %v91_v21 = vmul.f32 1.442695, %v73_v19 }
  0xa5   :  { %v42_v22 = vpop.xlane.xlu0 %41  ;;  %v46_v23 = vpop.xlane.xlu1 %45 }
  0xa6   :  { %220 = vpow2.f32 %v87_v20  ;;  %v72_v24 = vsub.f32 %v24_v2, %v42_v22  ;;  %v74_v25 = vsub.f32 %v26_v3, %v46_v23 }
  0xa7   :  { %222 = vpow2.f32 %v91_v21 }
  0xa8   :  { %v89_v26 = vmul.f32 1.442695, %v72_v24  ;;  %v93_v27 = vmul.f32 1.442695, %v74_v25 }
  0xa9   :  { %v48_v28 = vpop.xlane.xlu0 %47  ;;  %v50_v29 = vpop.xlane.xlu1 %49 }
  0xaa   :  { %224 = vpow2.f32 %v89_v26  ;;  %v75_v30 = vsub.f32 %v27_v4, %v48_v28  ;;  %v76_v31 = vsub.f32 %v28_v5, %v50_v29 }
  0xab   :  { %226 = vpow2.f32 %v93_v27 }
  0xac   :  { %v95_v32 = vmul.f32 1.442695, %v75_v30  ;;  %v97_v33 = vmul.f32 1.442695, %v76_v31 }
  0xad   :  { %v52_v34 = vpop.xlane.xlu0 %51  ;;  %v54_v35 = vpop.xlane.xlu1 %53 }
  0xae   :  { %228 = vpow2.f32 %v95_v32  ;;  %v77_v36 = vsub.f32 %v29_v6, %v52_v34  ;;  %v78_v37 = vsub.f32 %v30_v7, %v54_v35 }
  0xaf   :  { %230 = vpow2.f32 %v97_v33 }
  0xb0   :  { %v379_v38 = vpop.eup %220  ;;  %v99_v39 = vmul.f32 1.442695, %v77_v36  ;;  %v101_v40 = vmul.f32 1.442695, %v78_v37 }
  0xb1   :  { %119 = vadd.xlane.f32.xlu0 %v379_v38  ;;  %v56_v41 = vpop.xlane.xlu0 %55  ;;  %v58_v42 = vpop.xlane.xlu1 %57 }
  0xb2   :  { %v382_v43 = vpop.eup %222  ;;  %232 = vpow2.f32 %v99_v39  ;;  %v79_v44 = vsub.f32 %v31_v8, %v56_v41  ;;  %v80_v45 = vsub.f32 %v32_v9, %v58_v42 }
  0xb3   :  { %234 = vpow2.f32 %v101_v40 }
  0xb4   :  { %v384_v46 = vpop.eup %224  ;;  %v103_v47 = vmul.f32 1.442695, %v79_v44  ;;  %v105_v48 = vmul.f32 1.442695, %v80_v45 }
  0xb5   :  { %123 = vadd.xlane.f32.xlu0 %v382_v43  ;;  %121 = vadd.xlane.f32.xlu1 %v384_v46  ;;  %v60_v49 = vpop.xlane.xlu0 %59  ;;  %v62_v50 = vpop.xlane.xlu1 %61 }
  0xb6   :  { %v388_v51 = vpop.eup %226  ;;  %236 = vpow2.f32 %v103_v47  ;;  %v81_v52 = vsub.f32 %v361_v10, %v60_v49  ;;  %v82_v53 = vsub.f32 %v363_v11, %v62_v50 }
  0xb7   :  { %238 = vpow2.f32 %v105_v48 }
  0xb8   :  { %v392_v54 = vpop.eup %228  ;;  %v107_v55 = vmul.f32 1.442695, %v81_v52  ;;  %v109_v56 = vmul.f32 1.442695, %v82_v53 }
  0xb9   :  { %125 = vadd.xlane.f32.xlu1 %v388_v51  ;;  %127 = vadd.xlane.f32.xlu0 %v392_v54  ;;  %v64_v57 = vpop.xlane.xlu0 %63  ;;  %v66_v58 = vpop.xlane.xlu1 %65 }
  0xba   :  { %v396_v59 = vpop.eup %230  ;;  %240 = vpow2.f32 %v107_v55  ;;  %v83_v60 = vsub.f32 %v367_v12, %v64_v57  ;;  %v84_v61 = vsub.f32 %v369_v13, %v66_v58 }
  0xbb   :  { %242 = vpow2.f32 %v109_v56 }
  0xbc   :  { %v400_v62 = vpop.eup %232  ;;  %v111_v63 = vmul.f32 1.442695, %v83_v60  ;;  %v113_v0 = vmul.f32 1.442695, %v84_v61 }
  0xbd   :  { %129 = vadd.xlane.f32.xlu1 %v396_v59  ;;  %131 = vadd.xlane.f32.xlu0 %v400_v62  ;;  %v68_v1 = vpop.xlane.xlu0 %67  ;;  %v70_v2 = vpop.xlane.xlu1 %69 }
  0xbe   :  { %v404_v3 = vpop.eup %234  ;;  %244 = vpow2.f32 %v111_v63  ;;  %v85_v4 = vsub.f32 %v373_v14, %v68_v1  ;;  %v86_v5 = vsub.f32 %v375_v15, %v70_v2 }
  0xbf   :  { %246 = vpow2.f32 %v113_v0 }
  0xc0   :  { %v408_v6 = vpop.eup %236  ;;  %v115_v7 = vmul.f32 1.442695, %v85_v4  ;;  %v117_v8 = vmul.f32 1.442695, %v86_v5 }
  0xc1   :  { %133 = vadd.xlane.f32.xlu1 %v404_v3  ;;  %135 = vadd.xlane.f32.xlu0 %v408_v6  ;;  %v412_v9 = vpop.eup %238 }
  0xc2   :  { %248 = vpow2.f32 %v115_v7 }
  0xc3   :  { %250 = vpow2.f32 %v117_v8 }
  0xc4   :  { %v414_v10 = vpop.eup %240 }
  0xc5   :  { %137 = vadd.xlane.f32.xlu1 %v412_v9  ;;  %139 = vadd.xlane.f32.xlu0 %v414_v10  ;;  %v418_v11 = vpop.eup %242 }
  0xc8   :  { %v420_v12 = vpop.eup %244 }
  0xc9   :  { %141 = vadd.xlane.f32.xlu1 %v418_v11  ;;  %143 = vadd.xlane.f32.xlu0 %v420_v12  ;;  %v424_v13 = vpop.eup %246 }
  0xcc   :  { %v426_v14 = vpop.eup %248 }
  0xcd   :  { %145 = vadd.xlane.f32.xlu1 %v424_v13  ;;  %147 = vadd.xlane.f32.xlu0 %v426_v14  ;;  %v430_v15 = vpop.eup %250 }
  0xd1   :  { %149 = vadd.xlane.f32.xlu1 %v430_v15 }
 0x13e   :  { %v120_v16 = vpop.xlane.xlu0 %119 }
 0x13f   :  { %252 = vrcp.f32 %v120_v16 }
 0x142   :  { %v122_v17 = vpop.xlane.xlu1 %121  ;;  %v124_v18 = vpop.xlane.xlu0 %123 }
 0x143   :  { %254 = vrcp.f32 %v122_v17 }
 0x144   :  { %256 = vrcp.f32 %v124_v18 }
 0x146   :  { %v126_v19 = vpop.xlane.xlu1 %125  ;;  %v128_v20 = vpop.xlane.xlu0 %127 }
 0x147   :  { %258 = vrcp.f32 %v126_v19 }
 0x148   :  { %260 = vrcp.f32 %v128_v20 }
 0x149   :  { %v253_v21 = vpop.eup %252 }
 0x14a   :  { %v167_v22 = vmul.f32 %v253_v21, %v379_v38  ;;  %v130_v23 = vpop.xlane.xlu1 %129  ;;  %v132_v24 = vpop.xlane.xlu0 %131 }
 0x14b   :  { %262 = vrcp.f32 %v130_v23 }
 0x14c   :  { %183 = vst [vmem:[#allocation5] sm:$0xff] %v167_v22  ;;  %264 = vrcp.f32 %v132_v24 }
 0x14d   :  { %v255_v25 = vpop.eup %254 }
 0x14e   :  { %v257_v26 = vpop.eup %256  ;;  %v168_v27 = vmul.f32 %v255_v25, %v384_v46  ;;  %v134_v28 = vpop.xlane.xlu1 %133 }
 0x14f   :  { %v136_v29 = vpop.xlane.xlu0 %135  ;;  %v169_v30 = vmul.f32 %v257_v26, %v382_v43  ;;  %266 = vrcp.f32 %v134_v28 }
 0x150   :  { %184 = vst [vmem:[#allocation5 + $0x8] sm:$0xff] %v168_v27  ;;  %268 = vrcp.f32 %v136_v29 }
 0x151   :  { %v259_v31 = vpop.eup %258  ;;  %185 = vst [vmem:[#allocation5 + $0x10] sm:$0xff] %v169_v30 }
 0x152   :  { %v261_v32 = vpop.eup %260  ;;  %v170_v33 = vmul.f32 %v259_v31, %v388_v51  ;;  %v138_v34 = vpop.xlane.xlu1 %137 }
 0x153   :  { %v140_v35 = vpop.xlane.xlu0 %139  ;;  %v171_v36 = vmul.f32 %v261_v32, %v392_v54  ;;  %270 = vrcp.f32 %v138_v34 }
 0x154   :  { %186 = vst [vmem:[#allocation5 + $0x18] sm:$0xff] %v170_v33  ;;  %272 = vrcp.f32 %v140_v35 }
 0x155   :  { %v263_v37 = vpop.eup %262  ;;  %187 = vst [vmem:[#allocation5 + $0x20] sm:$0xff] %v171_v36 }
 0x156   :  { %v265_v38 = vpop.eup %264  ;;  %v172_v39 = vmul.f32 %v263_v37, %v396_v59  ;;  %v142_v40 = vpop.xlane.xlu1 %141 }
 0x157   :  { %v144_v41 = vpop.xlane.xlu0 %143  ;;  %v173_v42 = vmul.f32 %v265_v38, %v400_v62  ;;  %274 = vrcp.f32 %v142_v40 }
 0x158   :  { %188 = vst [vmem:[#allocation5 + $0x28] sm:$0xff] %v172_v39  ;;  %276 = vrcp.f32 %v144_v41 }
 0x159   :  { %v267_v43 = vpop.eup %266  ;;  %189 = vst [vmem:[#allocation5 + $0x30] sm:$0xff] %v173_v42 }
 0x15a   :  { %v269_v44 = vpop.eup %268  ;;  %v174_v45 = vmul.f32 %v267_v43, %v404_v3  ;;  %v146_v46 = vpop.xlane.xlu1 %145 }
 0x15b   :  { %v148_v47 = vpop.xlane.xlu0 %147  ;;  %v175_v48 = vmul.f32 %v269_v44, %v408_v6  ;;  %278 = vrcp.f32 %v146_v46 }
 0x15c   :  { %190 = vst [vmem:[#allocation5 + $0x38] sm:$0xff] %v174_v45  ;;  %280 = vrcp.f32 %v148_v47 }
 0x15d   :  { %v271_v49 = vpop.eup %270  ;;  %191 = vst [vmem:[#allocation5 + $0x40] sm:$0xff] %v175_v48 }
 0x15e   :  { %v273_v50 = vpop.eup %272  ;;  %v176_v51 = vmul.f32 %v271_v49, %v412_v9  ;;  %v150_v52 = vpop.xlane.xlu1 %149 }
 0x15f   :  { %v177_v53 = vmul.f32 %v273_v50, %v414_v10  ;;  %282 = vrcp.f32 %v150_v52 }
 0x160   :  { %192 = vst [vmem:[#allocation5 + $0x48] sm:$0xff] %v176_v51 }
 0x161   :  { %v275_v54 = vpop.eup %274  ;;  %193 = vst [vmem:[#allocation5 + $0x50] sm:$0xff] %v177_v53 }
 0x162   :  { %v277_v55 = vpop.eup %276  ;;  %v178_v56 = vmul.f32 %v275_v54, %v418_v11 }
 0x163   :  { %v179_v57 = vmul.f32 %v277_v55, %v420_v12 }
 0x164   :  { %194 = vst [vmem:[#allocation5 + $0x58] sm:$0xff] %v178_v56 }
 0x165   :  { %v279_v58 = vpop.eup %278  ;;  %195 = vst [vmem:[#allocation5 + $0x60] sm:$0xff] %v179_v57 }
 0x166   :  { %v281_v59 = vpop.eup %280  ;;  %v180_v60 = vmul.f32 %v279_v58, %v424_v13 }
 0x167   :  { %v181_v61 = vmul.f32 %v281_v59, %v426_v14 }
 0x168   :  { %196 = vst [vmem:[#allocation5 + $0x68] sm:$0xff] %v180_v60 }
 0x169   :  { %v283_v62 = vpop.eup %282  ;;  %197 = vst [vmem:[#allocation5 + $0x70] sm:$0xff] %v181_v61 }
 0x16a   :  { %v182_v63 = vmul.f32 %v283_v62, %v430_v15 }
 0x16c   :  { %198 = vst [vmem:[#allocation5 + $0x78] sm:$0xff] %v182_v63 }
 0x16d   :  { %317 = shalt.err (!%p314_p12)
}
 0x16e   :  { %s318_s24 = scalar_lea.hbm %s465_s1, 2048 }
 0x16f   :  { %p319_p13 = scmp.ne.s32.totalorder %s465_s1, %s318_s24  ;;  %p322_p0 = scmp.lt.u32.totalorder %s318_s24, %s465_s1 }
 0x171   :  { %p324_p1 = pnand %p322_p0, %p319_p13 }
 0x173   :  { %327 = shalt.err (!%p324_p1)
}
 0x174   :  { %210 = dma.vmem_to_hbm [thread:$0]  %s205_s20, 2048, %s465_s1, [#allocation4], %s333_s16, %s333_s16, %s334_s17  }
 0x175   :  { %330 = dma.done.wait [#allocation4], 2048  }
 0x176   :  { %331 = vsyncadd [#allocation4], 4294965248 }
 0x177   :  { %214 = vsyncpa [#allocation3], 1 }
 0x178   :  { %215 = vsyncpa [#allocation4], 1 }

</bundles_post_ra>
